<compile_context>
chip_gen: v5e
topology: v5e:2x2
jax: 0.10.0
libtpu: 0.0.40
codegen_flags: <defaults>
</compile_context>

<pallas_src>
import functools

import jax
import jax.numpy as jnp
from jax.experimental import pallas as pl
from jax.experimental.pallas import tpu as pltpu

LANES = 128


def _align8(n):
    return ((n + 7) // 8) * 8


def make_layout(obs_dim, hidden):
    """Row offsets of each fused tensor inside the (rows, 128) parameter slab.

    Every section starts on a sublane (8-row) boundary so in-kernel ref slices are aligned.
    """
    sections = [
        ("wc1", obs_dim),      # c1 weight (obs, H)            cols [0:H]
        ("bc1", 1),            # c1 bias                       cols [0:H]
        ("wc2", hidden),       # c2 weight (H, H)              cols [0:H]
        ("bc2", 1),            # c2 bias                       cols [0:H]
        ("wh1", hidden),       # fused [wa1 | wv1] (H, 2H)     cols [0:2H]
        ("bh1", 1),            # fused [ba1 | bv1]             cols [0:2H]
        ("wh2", 2 * hidden),   # block-diag [wa2 ; wv2] padded cols [0:128]
        ("bh2", 1),            # fused [ba2 | bv2 | 0...]      cols [0:128]
    ]
    layout, off = {}, 0
    for name, nrows in sections:
        layout[name] = off
        off += _align8(nrows)
    return layout, _align8(off)


def pack_params(params, obs_dim, action_dim, hidden=16):
    """Pack 12 per-layer tensors into ONE lane-dense (rows, 128) f32 slab (done once)."""
    (wc1, bc1, wc2, bc2, wa1, ba1, wa2, ba2, wv1, bv1, wv2, bv2) = params
    layout, total_rows = make_layout(obs_dim, hidden)
    H, A = hidden, action_dim

    slab = jnp.zeros((total_rows, LANES), jnp.float32)
    slab = slab.at[layout["wc1"]:layout["wc1"] + obs_dim, 0:H].set(wc1)
    slab = slab.at[layout["bc1"], 0:H].set(bc1[0])
    slab = slab.at[layout["wc2"]:layout["wc2"] + H, 0:H].set(wc2)
    slab = slab.at[layout["bc2"], 0:H].set(bc2[0])
    # head layer 1: [a | v]
    slab = slab.at[layout["wh1"]:layout["wh1"] + H, 0:H].set(wa1)
    slab = slab.at[layout["wh1"]:layout["wh1"] + H, H:2 * H].set(wv1)
    slab = slab.at[layout["bh1"], 0:H].set(ba1[0])
    slab = slab.at[layout["bh1"], H:2 * H].set(bv1[0])
    # head layer 2: block-diagonal, lane-padded (logits in cols [0:A], value in col A)
    slab = slab.at[layout["wh2"]:layout["wh2"] + H, 0:A].set(wa2)
    slab = slab.at[layout["wh2"] + H:layout["wh2"] + 2 * H, A:A + 1].set(wv2)
    slab = slab.at[layout["bh2"], 0:A].set(ba2[0])
    slab = slab.at[layout["bh2"], A].set(bv2[0, 0])
    return slab, layout


def make_policy_kernel(layout, obs_dim, hidden, action_dim):
    H, A = hidden, action_dim
    r_wc1, r_bc1 = layout["wc1"], layout["bc1"]
    r_wc2, r_bc2 = layout["wc2"], layout["bc2"]
    r_wh1, r_bh1 = layout["wh1"], layout["bh1"]
    r_wh2, r_bh2 = layout["wh2"], layout["bh2"]

    def kernel(state_ref, param_ref, out_ref):
        x = state_ref[...]                                                   # (B, obs)

        # shared trunk: relu(c1), relu(c2)
        wc1 = param_ref[r_wc1:r_wc1 + obs_dim, 0:H]
        bc1 = param_ref[r_bc1:r_bc1 + 1, 0:H]
        h = jnp.maximum(jnp.dot(x, wc1, preferred_element_type=jnp.float32) + bc1, 0.0)

        wc2 = param_ref[r_wc2:r_wc2 + H, 0:H]
        bc2 = param_ref[r_bc2:r_bc2 + 1, 0:H]
        h = jnp.maximum(jnp.dot(h, wc2, preferred_element_type=jnp.float32) + bc2, 0.0)

        # fused head layer 1:  [a | v] = relu(h @ [wa1|wv1] + [ba1|bv1])      (B, 2H)
        wh1 = param_ref[r_wh1:r_wh1 + H, 0:2 * H]
        bh1 = param_ref[r_bh1:r_bh1 + 1, 0:2 * H]
        av = jnp.maximum(jnp.dot(h, wh1, preferred_element_type=jnp.float32) + bh1, 0.0)

        # fused head layer 2 (block-diagonal, lane-padded to 128 lanes):
        #   cols [0:A] = actor logits, col A = raw state value, cols > A = 0
        wh2 = param_ref[r_wh2:r_wh2 + 2 * H, :]                              # (2H, 128)
        bh2 = param_ref[r_bh2:r_bh2 + 1, :]                                  # (1, 128)
        out2 = jnp.dot(av, wh2, preferred_element_type=jnp.float32) + bh2    # (B, 128)

        col = jax.lax.broadcasted_iota(jnp.int32, out2.shape, 1)
        is_logit = col < A
        is_value = col == A

        # softmax over the real action columns only (padding masked so exp underflows to 0)
        logits = jnp.where(is_logit, out2, jnp.float32(-1e30))
        m = jnp.max(logits, axis=-1, keepdims=True)
        e = jnp.exp(logits - m)
        denom = jnp.sum(e, axis=-1, keepdims=True)
        probs = e * pl.reciprocal(denom, approx=True)                        # EUP slot

        value = jnp.where(is_value, jnp.maximum(out2, 0.0), 0.0)             # relu(v2(...))

        out_ref[...] = probs + value                                         # one lane-dense store

    return kernel


@functools.partial(jax.jit, static_argnames=("obs_dim", "hidden", "action_dim"))
def policy_forward(state, param_slab, *, obs_dim, hidden, action_dim):
    """state: (B, obs_dim) f32; param_slab: packed (rows, 128) f32 parameter slab."""
    layout, _ = make_layout(obs_dim, hidden)
    kernel = make_policy_kernel(layout, obs_dim, hidden, action_dim)
    B = state.shape[0]
    vmem = pl.BlockSpec(memory_space=pltpu.MemorySpace.VMEM)
    out = pl.pallas_call(
        kernel,
        out_shape=jax.ShapeDtypeStruct((B, LANES), jnp.float32),
        in_specs=[vmem, vmem],
        out_specs=vmem,
    )(state, param_slab)
    # Slice the packed lane-dense output apart OUTSIDE the kernel.
    action_prob = out[:, :action_dim]
    state_value = out[:, action_dim:action_dim + 1]
    return action_prob, state_value


def init_params(key, obs_dim, action_dim, hidden=16):
    """Deterministic init matching PyTorch nn.Linear default (U[-1/sqrt(fan_in), +])."""
    def linear(key, fan_in, fan_out):
        kw, kb = jax.random.split(key)
        bound = 1.0 / jnp.sqrt(jnp.float32(fan_in))
        w = jax.random.uniform(kw, (fan_in, fan_out), jnp.float32, -bound, bound)
        b = jax.random.uniform(kb, (1, fan_out), jnp.float32, -bound, bound)
        return w, b

    keys = jax.random.split(key, 6)
    wc1, bc1 = linear(keys[0], obs_dim, hidden)      # c1
    wc2, bc2 = linear(keys[1], hidden, hidden)       # c2
    wa1, ba1 = linear(keys[2], hidden, hidden)       # a1
    wa2, ba2 = linear(keys[3], hidden, action_dim)   # a2
    wv1, bv1 = linear(keys[4], hidden, hidden)       # v1
    wv2, bv2 = linear(keys[5], hidden, 1)            # v2
    return (wc1, bc1, wc2, bc2, wa1, ba1, wa2, ba2, wv1, bv1, wv2, bv2)


def reference_forward(state, params):
    """Pure-JAX reference with the exact PyTorch forward semantics."""
    (wc1, bc1, wc2, bc2, wa1, ba1, wa2, ba2, wv1, bv1, wv2, bv2) = params
    h = jnp.maximum(state @ wc1 + bc1, 0.0)
    h = jnp.maximum(h @ wc2 + bc2, 0.0)
    a = jnp.maximum(h @ wa1 + ba1, 0.0)
    probs = jax.nn.softmax(a @ wa2 + ba2, axis=1)
    v = jnp.maximum(h @ wv1 + bv1, 0.0)
    val = jnp.maximum(v @ wv2 + bv2, 0.0)
    return probs, val


if __name__ == "__main__":
    # Small shapes implied by the module (CartPole-like env).
    obs_dim, action_dim, hidden, batch = 4, 2, 16, 2

    key = jax.random.PRNGKey(0)
    k_state, k_params = jax.random.split(key)

    state = jax.random.normal(k_state, (batch, obs_dim), jnp.float32)
    params = init_params(k_params, obs_dim, action_dim, hidden)
    slab, _ = pack_params(params, obs_dim, action_dim, hidden)

    action_prob, state_value = policy_forward(
        state, slab, obs_dim=obs_dim, hidden=hidden, action_dim=action_dim)
    action_prob = jax.block_until_ready(action_prob)
    state_value = jax.block_until_ready(state_value)

    ref_prob, ref_value = reference_forward(state, params)

    assert action_prob.shape == (batch, action_dim)
    assert state_value.shape == (batch, 1)
    # softmax rows must sum to 1 (approx reciprocal -> slightly looser tolerance)
    assert jnp.allclose(jnp.sum(action_prob, axis=1), 1.0, atol=2e-3)
    # value passed through a final relu -> non-negative
    assert bool(jnp.all(state_value >= 0.0))
    # match the pure-JAX reference
    assert jnp.allclose(action_prob, ref_prob, atol=2e-3, rtol=2e-3)
    assert jnp.allclose(state_value, ref_value, atol=1e-4, rtol=1e-4)

    print("KERNEL_OK")
</pallas_src>

<mosaic_0001>
module attributes {stable_mosaic.version = 11 : i64} {
  func.func @kernel(%arg0: memref<2x4xf32, #tpu.memory_space<vmem>>, %arg1: memref<104x128xf32, #tpu.memory_space<vmem>>, %arg2: memref<2x128xf32, #tpu.memory_space<vmem>>) attributes {dimension_semantics = [], scalar_prefetch = 0 : i64, scratch_operands = 0 : i64, tpu.core_type = #tpu.core_type<tc>} {
    %c0 = arith.constant 0 : index
    %c0_0 = arith.constant 0 : index
    %0 = vector.load %arg0[%c0, %c0_0] : memref<2x4xf32, #tpu.memory_space<vmem>>, vector<2x4xf32>
    %c0_1 = arith.constant 0 : index
    %c0_2 = arith.constant 0 : index
    %1 = vector.load %arg1[%c0_1, %c0_2] : memref<104x128xf32, #tpu.memory_space<vmem>>, vector<4x16xf32>
    %c8 = arith.constant 8 : index
    %c0_3 = arith.constant 0 : index
    %2 = vector.load %arg1[%c8, %c0_3] : memref<104x128xf32, #tpu.memory_space<vmem>>, vector<1x16xf32>
    %cst = arith.constant dense<0.000000e+00> : vector<2x16xf32>
    %3 = tpu.matmul %0, %1, %cst {dimension_numbers = #tpu.dot_dimension_numbers<[1], [0], [0], [1], [0, 0, 1, 1], [], []>} : vector<2x4xf32>, vector<4x16xf32>, vector<2x16xf32> -> vector<2x16xf32>
    %4 = vector.broadcast %2 : vector<1x16xf32> to vector<2x16xf32>
    %5 = arith.addf %3, %4 : vector<2x16xf32>
    %cst_4 = arith.constant 0.000000e+00 : f32
    %6 = vector.broadcast %cst_4 : f32 to vector<2x16xf32>
    %7 = arith.maximumf %5, %6 : vector<2x16xf32>
    %c16 = arith.constant 16 : index
    %c0_5 = arith.constant 0 : index
    %8 = vector.load %arg1[%c16, %c0_5] : memref<104x128xf32, #tpu.memory_space<vmem>>, vector<16x16xf32>
    %c32 = arith.constant 32 : index
    %c0_6 = arith.constant 0 : index
    %9 = vector.load %arg1[%c32, %c0_6] : memref<104x128xf32, #tpu.memory_space<vmem>>, vector<1x16xf32>
    %cst_7 = arith.constant dense<0.000000e+00> : vector<2x16xf32>
    %10 = tpu.matmul %7, %8, %cst_7 {dimension_numbers = #tpu.dot_dimension_numbers<[1], [0], [0], [1], [0, 0, 1, 1], [], []>} : vector<2x16xf32>, vector<16x16xf32>, vector<2x16xf32> -> vector<2x16xf32>
    %11 = vector.broadcast %9 : vector<1x16xf32> to vector<2x16xf32>
    %12 = arith.addf %10, %11 : vector<2x16xf32>
    %cst_8 = arith.constant 0.000000e+00 : f32
    %13 = vector.broadcast %cst_8 : f32 to vector<2x16xf32>
    %14 = arith.maximumf %12, %13 : vector<2x16xf32>
    %c40 = arith.constant 40 : index
    %c0_9 = arith.constant 0 : index
    %15 = vector.load %arg1[%c40, %c0_9] : memref<104x128xf32, #tpu.memory_space<vmem>>, vector<16x32xf32>
    %c56 = arith.constant 56 : index
    %c0_10 = arith.constant 0 : index
    %16 = vector.load %arg1[%c56, %c0_10] : memref<104x128xf32, #tpu.memory_space<vmem>>, vector<1x32xf32>
    %cst_11 = arith.constant dense<0.000000e+00> : vector<2x32xf32>
    %17 = tpu.matmul %14, %15, %cst_11 {dimension_numbers = #tpu.dot_dimension_numbers<[1], [0], [0], [1], [0, 0, 1, 1], [], []>} : vector<2x16xf32>, vector<16x32xf32>, vector<2x32xf32> -> vector<2x32xf32>
    %18 = vector.broadcast %16 : vector<1x32xf32> to vector<2x32xf32>
    %19 = arith.addf %17, %18 : vector<2x32xf32>
    %cst_12 = arith.constant 0.000000e+00 : f32
    %20 = vector.broadcast %cst_12 : f32 to vector<2x32xf32>
    %21 = arith.maximumf %19, %20 : vector<2x32xf32>
    %c64 = arith.constant 64 : index
    %c0_13 = arith.constant 0 : index
    %22 = vector.load %arg1[%c64, %c0_13] : memref<104x128xf32, #tpu.memory_space<vmem>>, vector<32x128xf32>
    %c96 = arith.constant 96 : index
    %c0_14 = arith.constant 0 : index
    %23 = vector.load %arg1[%c96, %c0_14] : memref<104x128xf32, #tpu.memory_space<vmem>>, vector<1x128xf32>
    %cst_15 = arith.constant dense<0.000000e+00> : vector<2x128xf32>
    %24 = tpu.matmul %21, %22, %cst_15 {dimension_numbers = #tpu.dot_dimension_numbers<[1], [0], [0], [1], [0, 0, 1, 1], [], []>} : vector<2x32xf32>, vector<32x128xf32>, vector<2x128xf32> -> vector<2x128xf32>
    %25 = vector.broadcast %23 : vector<1x128xf32> to vector<2x128xf32>
    %26 = arith.addf %24, %25 : vector<2x128xf32>
    %27 = tpu.iota {dimensions = array<i32: 1>} : vector<2x128xi32>
    %c2_i32 = arith.constant 2 : i32
    %28 = vector.broadcast %c2_i32 : i32 to vector<2x128xi32>
    %29 = arith.cmpi slt, %27, %28 : vector<2x128xi32>
    %c2_i32_16 = arith.constant 2 : i32
    %30 = vector.broadcast %c2_i32_16 : i32 to vector<2x128xi32>
    %31 = arith.cmpi eq, %27, %30 : vector<2x128xi32>
    %cst_17 = arith.constant -1.000000e+30 : f32
    %32 = vector.broadcast %cst_17 : f32 to vector<2x128xf32>
    %33 = arith.select %29, %26, %32 : vector<2x128xi1>, vector<2x128xf32>
    %cst_18 = arith.constant dense<0xFF800000> : vector<2xf32>
    %34 = vector.multi_reduction <maximumf>, %33, %cst_18 [1] : vector<2x128xf32> to vector<2xf32>
    %35 = vector.shape_cast %34 : vector<2xf32> to vector<2x1xf32>
    %36 = vector.broadcast %35 : vector<2x1xf32> to vector<2x128xf32>
    %37 = arith.subf %33, %36 : vector<2x128xf32>
    %38 = math.exp %37 : vector<2x128xf32>
    %cst_19 = arith.constant dense<0.000000e+00> : vector<2xf32>
    %39 = vector.multi_reduction <add>, %38, %cst_19 [1] : vector<2x128xf32> to vector<2xf32>
    %40 = vector.shape_cast %39 : vector<2xf32> to vector<2x1xf32>
    %41 = tpu.reciprocal %40 {approx = true} : vector<2x1xf32> -> vector<2x1xf32>
    %42 = vector.broadcast %41 : vector<2x1xf32> to vector<2x128xf32>
    %43 = arith.mulf %38, %42 : vector<2x128xf32>
    %cst_20 = arith.constant 0.000000e+00 : f32
    %44 = vector.broadcast %cst_20 : f32 to vector<2x128xf32>
    %45 = arith.maximumf %26, %44 : vector<2x128xf32>
    %cst_21 = arith.constant 0.000000e+00 : f32
    %46 = vector.broadcast %cst_21 : f32 to vector<2x128xf32>
    %47 = arith.select %31, %45, %46 : vector<2x128xi1>, vector<2x128xf32>
    %48 = arith.addf %43, %47 : vector<2x128xf32>
    %c0_22 = arith.constant 0 : index
    %c0_23 = arith.constant 0 : index
    %49 = vector.load %arg2[%c0_22, %c0_23] : memref<2x128xf32, #tpu.memory_space<vmem>>, vector<2x128xf32>
    tpu.vector_store %arg2[%c0_22, %c0_23], %48 {strides = array<i32>} : memref<2x128xf32, #tpu.memory_space<vmem>>, vector<2x128xf32>,
    return
  }
}

</mosaic_0001>

<bundles_post_ra>
// kernel: policy_forward.1
= control target key start
LH: loop header
LB: loop body
LE: loop exit
PB: predicated region body
PF: predicated region fallthrough
CT: control target
= control target key end

     0   :  { %7 = vsyncpa [#allocation3], 0  ;;  %s285_s0 = inlined_call_operand.hbm [shape: f32[2,4], index: 0, kind: input, shape index: {}]   ;;  %s286_s1 = inlined_call_operand.hbm [shape: f32[104,128], index: 1, kind: input, shape index: {}]   ;;  %s287_s2 = inlined_call_operand.vmem [shape: f32[2,128], index: 2, kind: output, shape index: {}]  }
   0x1   :  { %s14_s11 = sshll.u32 %s285_s0, 4  ;;  %s15_s11 = int_to_ptr.hbm [resolvable:$true] %s14_s11 }
   0x2   :  { %8 = vsyncpa [#allocation5], 0  ;;  %s257_s12 = smov [#allocation2]   ;;  %s24_s16 = sshll.u32 %s286_s1, 4  ;;  %s25_s16 = int_to_ptr.hbm [resolvable:$true] %s24_s16 }
   0x3   :  { %s16_s13 = sshll.u32 %s257_s12, 4  ;;  %s258_s17 = smov [#allocation4]   ;;  %s17_s13 = int_to_ptr.vmem [resolvable:$true] %s16_s13 }
   0x4   :  { %19 = dma.hbm_to_vmem [thread:$0]  %s15_s11, 32, %s17_s13, [#allocation3]  }
   0x5   :  { %s26_s18 = sshll.u32 %s258_s17, 4  ;;  %s259_s19 = smov 128   ;;  %s27_s18 = int_to_ptr.vmem [resolvable:$true] %s26_s18 }
   0x6   :  { %s260_s20 = smov 8  }
   0x7   :  { %32 = dma.hbm_to_vmem [thread:$0]  %s25_s16, 1664, %s27_s18, [#allocation5], %s259_s19, %s259_s19, %s260_s20  }
   0x8   :  { %253 = dma.done.wait [#allocation3], 32  }
   0x9   :  { %254 = vsyncadd [#allocation3], 4294967264 }
   0xa   :  { %255 = dma.done.wait [#allocation5], 1664  }
   0xb   :  { %256 = vsyncadd [#allocation5], 4294965632  ;;  %vm49_vm0 = vcmask 1043456   ;;  %vm45_vm1 = vcmask 31744   ;;  %v42_v0 = vld [vmem:[#allocation4] sm:$0xf]  ;;  %v161_v22 = vlaneseq }
   0xc   :  { %v41_v1 = vld [vmem:[#allocation2] sm:$0x3]  ;;  %188 = vmatpush.msk.msra.mxu0 %vm49_vm0, %v42_v0  ;;  %v74_v3 = vld [vmem:[#allocation4 + $0x10] sm:$0xff]  ;;  %v197_v4 = vld [vmem:[#allocation4 + $0x8] ss:$0 sm:$0xff]  ;;  %vm78_vm2 = vcmask 130048  }
   0xd   :  { %189 = vmatmul.msk.f32.vlgmr.msra.gmra.mxu0 %vm45_vm1, %v41_v1  ;;  %v75_v2 = vld [vmem:[#allocation4 + $0x18] sm:$0xff]  ;;  %v104_v8 = vld [vmem:[#allocation4 + $0x30] sm:$0xff]  ;;  %v103_v9 = vld [vmem:[#allocation4 + $0x28] sm:$0xff]  ;;  %vm137_vm3 = vcmask 261120   ;;  %v162_v23 = vand.u32 127, %v161_v22  ;;  %vm166_vm5 = vcmask 1041408  }
   0xe   :  { %96 = vmatpush.msra.mxu1 %v75_v2  ;;  %124 = vmatpush.msra.mxu2 %v104_v8  ;;  %v134_v10 = vld [vmem:[#allocation4 + $0x58] sm:$0xff]  ;;  %v198_v11 = vld [vmem:[#allocation4 + $0x20] ss:$0 sm:$0xff]  ;;  %v133_v15 = vld [vmem:[#allocation4 + $0x50] sm:$0xff] }
   0xf   :  { %153 = vmatpush.msra.mxu3 %v134_v10  ;;  %v132_v16 = vld [vmem:[#allocation4 + $0x48] sm:$0xff]  ;;  %v131_v17 = vld [vmem:[#allocation4 + $0x40] sm:$0xff]  ;;  %v199_v18 = vld [vmem:[#allocation4 + $0x38] ss:$0 sm:$0xff]  ;;  %vm163_vm4 = vcmp.lt.s32.totalorder %v162_v23, 2  ;;  %vm164_vm6 = vcmp.eq.s32.totalorder %v162_v23, 2 }
  0x10   :  { %97 = vmatpush.msra.mxu1 %v74_v3  ;;  %125 = vmatpush.msra.mxu2 %v103_v9  ;;  %v200_v24 = vld [vmem:[#allocation4 + $0x60] ss:$0 sm:$0xff] }
  0x11   :  { %154 = vmatpush.msra.mxu3 %v133_v15 }
  0x13   :  { %155 = vmatpush.msra.mxu3 %v132_v16 }
  0x15   :  { %156 = vmatpush.msra.mxu3 %v131_v17 }
  0x8a   :  { %v70_v5 = vpop.f32.mrf.mxu0 }
  0x8b   :  { %v71_v6 = vadd.f32 %v197_v4, %v70_v5 }
  0x8d   :  { %v73_v7 = vmax.f32 %v71_v6, 0.0 }
  0x8f   :  { %190 = vmatmul.msk.f32.vlgmr.msra.gmra.mxu1 %vm78_vm2, %v73_v7 }
 0x10c   :  { %v99_v12 = vpop.f32.mrf.mxu1 }
 0x10d   :  { %v100_v13 = vadd.f32 %v198_v11, %v99_v12 }
 0x10f   :  { %v102_v14 = vmax.f32 %v100_v13, 0.0 }
 0x111   :  { %191 = vmatmul.msk.f32.vlgmr.msra.gmra.mxu2 %vm78_vm2, %v102_v14 }
 0x194   :  { %v127_v19 = vpop.f32.mrf.mxu2 }
 0x195   :  { %v128_v20 = vadd.f32 %v199_v18, %v127_v19 }
 0x197   :  { %v130_v21 = vmax.f32 %v128_v20, 0.0 }
 0x199   :  { %192 = vmatmul.msk.f32.vlgmr.msra.gmra.mxu3 %vm137_vm3, %v130_v21 }
 0x21c   :  { %v158_v25 = vpop.f32.mrf.mxu3 }
 0x21d   :  { %v159_v26 = vadd.f32 %v200_v24, %v158_v25 }
 0x21f   :  { %v178_v27 = vmax.f32 %v159_v26, 0.0  ;;  %v165_v28 = vsel %vm163_vm4, %v159_v26, -1e+30 }
 0x220   :  { %v167_v29 = vsel %vm166_vm5, %v165_v28, -inf }
 0x221   :  { %v179_v30 = vsel %vm164_vm6, %v178_v27, 0.0  ;;  %168 = vmax.xlane.f32.xlu0 %v167_v29 }
 0x294   :  { %v169_v31 = vpop.xlane.xlu0 %168 }
 0x295   :  { %v170_v32 = vsub.f32 %v165_v28, %v169_v31 }
 0x297   :  { %v171_v33 = vmul.f32 1.442695, %v170_v32 }
 0x299   :  { %201 = vpow2.f32 %v171_v33 }
 0x29f   :  { %v202_v34 = vpop.eup %201 }
 0x2a0   :  { %v173_v35 = vsel %vm166_vm5, %v202_v34, 0.0 }
 0x2a1   :  { %174 = vadd.xlane.f32.xlu0 %v173_v35 }
 0x314   :  { %v175_v36 = vpop.xlane.xlu0 %174 }
 0x315   :  { %203 = vrcp.f32 %v175_v36 }
 0x31b   :  { %v204_v37 = vpop.eup %203 }
 0x31c   :  { %v177_v38 = vmul.f32 %v204_v37, %v202_v34 }
 0x31e   :  { %v180_v39 = vadd.f32 %v179_v30, %v177_v38 }
 0x320   :  { %181 = vst [vmem:[%s287_s2] sm:$0x3] %v180_v39 }
 0x321   :  { %186 = vsyncpa [#allocation3], 1 }
 0x322   :  { %187 = vsyncpa [#allocation5], 1 }

</bundles_post_ra>
